<compile_context>
chip_gen: v7x
topology: tpu7x:2x2x1
jax: 0.10.0
libtpu: 0.0.40
codegen_flags: <defaults>
</compile_context>

<pallas_src>
import jax
import jax.numpy as jnp
from jax.experimental import pallas as pl
from jax.experimental.pallas import tpu as pltpu


def _make_msf_kernel(nb):
    def kernel(wts_ref, *refs):
        branch_refs = refs[:nb]
        w_ref = refs[nb]          # (C_out, C_in)
        b_ref = refs[nb + 1]      # (C_out, 1)
        skip_ref = refs[nb + 2]   # (C, tile_hw)
        out_ref = refs[nb + 3]    # (C, tile_hw)

        # Weighted branch fusion (VPU). Softmax weights are precomputed and
        # read as scalars from SMEM, one multiply-add per branch.
        fused = wts_ref[0] * branch_refs[0][...]
        for i in range(1, nb):
            fused = fused + wts_ref[i] * branch_refs[i][...]

        # 1x1 conv as (C_out, C_in) x (C_in, HW_tile) matmul on the MXU,
        # then bias + residual, all in f32, cast back on store.
        proj = jnp.dot(w_ref[...], fused, preferred_element_type=jnp.float32)
        out_ref[...] = (proj + b_ref[...] + skip_ref[...]).astype(out_ref.dtype)

    return kernel


def multi_scale_fusion(branches, skip, alpha, proj_w, proj_b,
                       *, tile_hw=None, vmem_tile_budget=32 * 1024 * 1024):
    """branches: list of (N, C, H, W); skip: (N, C, H, W); proj_w: (C, C, 1, 1)."""
    n, c, h, w = skip.shape
    nb = len(branches)
    hw = h * w
    itemsize = jnp.dtype(skip.dtype).itemsize

    # --- pick the HW tile: as large as fits the VMEM budget ------------------
    if tile_hw is None:
        # double-buffered: nb branch blocks + skip block + output block
        bytes_per_col = 2 * (nb + 2) * c * itemsize
        tile_hw = max(128, vmem_tile_budget // max(bytes_per_col, 1))
        tile_hw = min(tile_hw, 2048)
    tile_hw = min(tile_hw, hw)
    if hw >= 128:
        tile_hw = max(128, (tile_hw // 128) * 128)   # keep lane-aligned
    else:
        tile_hw = hw                                  # full-extent block
    grid_hw = pl.cdiv(hw, tile_hw)                    # partial tail block is OK

    # --- host-side prep (all cheap / layout-free) -----------------------------
    weights = jax.nn.softmax(alpha.astype(jnp.float32))     # (NB,)  hoisted
    wmat = proj_w.reshape(c, c).astype(jnp.float32)         # (C_out, C_in)
    bias = proj_b.reshape(c, 1).astype(jnp.float32)         # (C_out, 1)

    br3 = [b.reshape(n, c, hw) for b in branches]           # free reshapes
    sk3 = skip.reshape(n, c, hw)

    tile_spec = pl.BlockSpec((None, c, tile_hw), lambda b, j: (b, 0, j))

    in_specs = (
        [pl.BlockSpec(memory_space=pltpu.MemorySpace.SMEM)]      # softmax weights
        + [tile_spec] * nb                                       # branches
        + [pl.BlockSpec((c, c), lambda b, j: (0, 0)),            # proj weight
           pl.BlockSpec((c, 1), lambda b, j: (0, 0)),            # proj bias
           tile_spec]                                            # skip
    )

    out = pl.pallas_call(
        _make_msf_kernel(nb),
        out_shape=jax.ShapeDtypeStruct((n, c, hw), skip.dtype),
        grid_spec=pltpu.PrefetchScalarGridSpec(
            num_scalar_prefetch=0,
            grid=(n, grid_hw),
            in_specs=in_specs,
            out_specs=tile_spec,
        ),
        compiler_params=pltpu.CompilerParams(
            dimension_semantics=("parallel", "parallel"),
            vmem_limit_bytes=48 * 1024 * 1024,   # headroom on v7x's 64 MiB VMEM
        ),
    )(weights, *br3, wmat, bias, sk3)

    return out.reshape(n, c, h, w)


if __name__ == "__main__":
    key = jax.random.PRNGKey(0)
    n, c, h, w, nb = 2, 32, 16, 16, 3
    keys = jax.random.split(key, nb + 3)

    branches = [jax.random.normal(keys[i], (n, c, h, w), jnp.float32)
                for i in range(nb)]
    skip = jax.random.normal(keys[nb], (n, c, h, w), jnp.float32)

    # Deterministic synthetic parameters (shapes per nn.Module.__init__).
    alpha = jnp.linspace(0.5, 1.5, nb).astype(jnp.float32)             # (NB,)
    proj_w = (jax.random.normal(keys[nb + 1], (c, c, 1, 1), jnp.float32)
              / jnp.sqrt(c))                                            # Conv2d weight
    proj_b = 0.1 * jax.random.normal(keys[nb + 2], (c,), jnp.float32)   # Conv2d bias

    out = jax.block_until_ready(
        multi_scale_fusion(branches, skip, alpha, proj_w, proj_b))

    # Pure-JAX reference for correctness.
    w_soft = jax.nn.softmax(alpha)
    fused_ref = sum(w_soft[i] * branches[i] for i in range(nb))
    proj_ref = (jnp.einsum('nchw,oc->nohw', fused_ref, proj_w.reshape(c, c))
                + proj_b[None, :, None, None])
    ref = proj_ref + skip

    assert out.shape == ref.shape and out.dtype == ref.dtype
    assert jnp.allclose(out, ref, atol=1e-4, rtol=1e-4), "mismatch vs reference"
    print("KERNEL_OK")
</pallas_src>

<mosaic_0001>
module attributes {stable_mosaic.version = 11 : i64} {
  func.func @kernel(%arg0: i32, %arg1: i32, %arg2: memref<3xf32, #tpu.memory_space<smem>>, %arg3: memref<1x32x256xf32, #tpu.memory_space<vmem>>, %arg4: memref<1x32x256xf32, #tpu.memory_space<vmem>>, %arg5: memref<1x32x256xf32, #tpu.memory_space<vmem>>, %arg6: memref<32x32xf32, #tpu.memory_space<vmem>>, %arg7: memref<32x1xf32, #tpu.memory_space<vmem>>, %arg8: memref<1x32x256xf32, #tpu.memory_space<vmem>>, %arg9: memref<1x32x256xf32, #tpu.memory_space<vmem>>) attributes {dimension_semantics = [#tpu.dimension_semantics<parallel>, #tpu.dimension_semantics<parallel>], iteration_bounds = array<i64: 2, 1>, scalar_prefetch = 0 : i64, scratch_operands = 0 : i64, tpu.core_type = #tpu.core_type<tc>, window_params = [{transform_indices = @transform_0, window_bounds = array<i64: 3>}, {transform_indices = @transform_1, window_bounds = array<i64: 1, 32, 256>}, {transform_indices = @transform_2, window_bounds = array<i64: 1, 32, 256>}, {transform_indices = @transform_3, window_bounds = array<i64: 1, 32, 256>}, {pipeline_mode = #tpu.pipeline_mode<synchronous>, transform_indices = @transform_4, window_bounds = array<i64: 32, 32>}, {pipeline_mode = #tpu.pipeline_mode<synchronous>, transform_indices = @transform_5, window_bounds = array<i64: 32, 1>}, {transform_indices = @transform_6, window_bounds = array<i64: 1, 32, 256>}, {transform_indices = @transform_7, window_bounds = array<i64: 1, 32, 256>}]} {
    %c0 = arith.constant 0 : index
    %0 = memref.load %arg2[%c0] : memref<3xf32, #tpu.memory_space<smem>>
    %c0_0 = arith.constant 0 : index
    %c0_1 = arith.constant 0 : index
    %c0_2 = arith.constant 0 : index
    %1 = vector.load %arg3[%c0_0, %c0_1, %c0_2] : memref<1x32x256xf32, #tpu.memory_space<vmem>>, vector<1x32x256xf32>
    %2 = vector.shape_cast %1 : vector<1x32x256xf32> to vector<32x256xf32>
    %3 = vector.broadcast %0 : f32 to vector<32x256xf32>
    %4 = arith.mulf %3, %2 : vector<32x256xf32>
    %c1 = arith.constant 1 : index
    %5 = memref.load %arg2[%c1] : memref<3xf32, #tpu.memory_space<smem>>
    %c0_3 = arith.constant 0 : index
    %c0_4 = arith.constant 0 : index
    %c0_5 = arith.constant 0 : index
    %6 = vector.load %arg4[%c0_3, %c0_4, %c0_5] : memref<1x32x256xf32, #tpu.memory_space<vmem>>, vector<1x32x256xf32>
    %7 = vector.shape_cast %6 : vector<1x32x256xf32> to vector<32x256xf32>
    %8 = vector.broadcast %5 : f32 to vector<32x256xf32>
    %9 = arith.mulf %8, %7 : vector<32x256xf32>
    %10 = arith.addf %4, %9 : vector<32x256xf32>
    %c2 = arith.constant 2 : index
    %11 = memref.load %arg2[%c2] : memref<3xf32, #tpu.memory_space<smem>>
    %c0_6 = arith.constant 0 : index
    %c0_7 = arith.constant 0 : index
    %c0_8 = arith.constant 0 : index
    %12 = vector.load %arg5[%c0_6, %c0_7, %c0_8] : memref<1x32x256xf32, #tpu.memory_space<vmem>>, vector<1x32x256xf32>
    %13 = vector.shape_cast %12 : vector<1x32x256xf32> to vector<32x256xf32>
    %14 = vector.broadcast %11 : f32 to vector<32x256xf32>
    %15 = arith.mulf %14, %13 : vector<32x256xf32>
    %16 = arith.addf %10, %15 : vector<32x256xf32>
    %c0_9 = arith.constant 0 : index
    %c0_10 = arith.constant 0 : index
    %17 = vector.load %arg6[%c0_9, %c0_10] : memref<32x32xf32, #tpu.memory_space<vmem>>, vector<32x32xf32>
    %cst = arith.constant dense<0.000000e+00> : vector<32x256xf32>
    %18 = tpu.matmul %17, %16, %cst {dimension_numbers = #tpu.dot_dimension_numbers<[1], [0], [0], [1], [0, 0, 1, 1], [], []>} : vector<32x32xf32>, vector<32x256xf32>, vector<32x256xf32> -> vector<32x256xf32>
    %c0_11 = arith.constant 0 : index
    %c0_12 = arith.constant 0 : index
    %19 = vector.load %arg7[%c0_11, %c0_12] : memref<32x1xf32, #tpu.memory_space<vmem>>, vector<32x1xf32>
    %20 = vector.broadcast %19 : vector<32x1xf32> to vector<32x256xf32>
    %21 = arith.addf %18, %20 : vector<32x256xf32>
    %c0_13 = arith.constant 0 : index
    %c0_14 = arith.constant 0 : index
    %c0_15 = arith.constant 0 : index
    %22 = vector.load %arg8[%c0_13, %c0_14, %c0_15] : memref<1x32x256xf32, #tpu.memory_space<vmem>>, vector<1x32x256xf32>
    %23 = vector.shape_cast %22 : vector<1x32x256xf32> to vector<32x256xf32>
    %24 = arith.addf %21, %23 : vector<32x256xf32>
    %c0_16 = arith.constant 0 : index
    %c0_17 = arith.constant 0 : index
    %c0_18 = arith.constant 0 : index
    %25 = vector.load %arg9[%c0_16, %c0_17, %c0_18] : memref<1x32x256xf32, #tpu.memory_space<vmem>>, vector<1x32x256xf32>
    %26 = vector.shape_cast %25 : vector<1x32x256xf32> to vector<32x256xf32>
    %27 = vector.shape_cast %24 : vector<32x256xf32> to vector<1x32x256xf32>
    tpu.vector_store %arg9[%c0_16, %c0_17, %c0_18], %27 {strides = array<i32>} : memref<1x32x256xf32, #tpu.memory_space<vmem>>, vector<1x32x256xf32>,
    return
  }
  func.func @transform_0(%arg0: i32, %arg1: i32) -> i32 {
    %c0_i32 = arith.constant 0 : i32
    %c0_i32_0 = arith.constant 0 : i32
    return %c0_i32 : i32
  }
  func.func @transform_1(%arg0: i32, %arg1: i32) -> (i32, i32, i32) {
    %c0_i32 = arith.constant 0 : i32
    %c0_i32_0 = arith.constant 0 : i32
    return %arg0, %c0_i32, %arg1 : i32, i32, i32
  }
  func.func @transform_2(%arg0: i32, %arg1: i32) -> (i32, i32, i32) {
    %c0_i32 = arith.constant 0 : i32
    %c0_i32_0 = arith.constant 0 : i32
    return %arg0, %c0_i32, %arg1 : i32, i32, i32
  }
  func.func @transform_3(%arg0: i32, %arg1: i32) -> (i32, i32, i32) {
    %c0_i32 = arith.constant 0 : i32
    %c0_i32_0 = arith.constant 0 : i32
    return %arg0, %c0_i32, %arg1 : i32, i32, i32
  }
  func.func @transform_4(%arg0: i32, %arg1: i32) -> (i32, i32) {
    %c0_i32 = arith.constant 0 : i32
    %c0_i32_0 = arith.constant 0 : i32
    %c0_i32_1 = arith.constant 0 : i32
    return %c0_i32, %c0_i32_0 : i32, i32
  }
  func.func @transform_5(%arg0: i32, %arg1: i32) -> (i32, i32) {
    %c0_i32 = arith.constant 0 : i32
    %c0_i32_0 = arith.constant 0 : i32
    %c0_i32_1 = arith.constant 0 : i32
    return %c0_i32, %c0_i32_0 : i32, i32
  }
  func.func @transform_6(%arg0: i32, %arg1: i32) -> (i32, i32, i32) {
    %c0_i32 = arith.constant 0 : i32
    %c0_i32_0 = arith.constant 0 : i32
    return %arg0, %c0_i32, %arg1 : i32, i32, i32
  }
  func.func @transform_7(%arg0: i32, %arg1: i32) -> (i32, i32, i32) {
    %c0_i32 = arith.constant 0 : i32
    %c0_i32_0 = arith.constant 0 : i32
    return %arg0, %c0_i32, %arg1 : i32, i32, i32
  }
}

</mosaic_0001>

<bundles_post_ra>
// kernel: tpu_custom_call.1
= control target key start
LH: loop header
LB: loop body
LE: loop exit
PB: predicated region body
PF: predicated region fallthrough
CT: control target
= control target key end

     0   :  { %s1725_s0 = inlined_call_operand.vmem [shape: f32[3], index: 0, kind: input, shape index: {}]   ;;  %s1726_s1 = inlined_call_operand.hbm [shape: f32[2,32,256], index: 1, kind: input, shape index: {}]   ;;  %s1727_s2 = inlined_call_operand.hbm [shape: f32[2,32,256], index: 2, kind: input, shape index: {}]   ;;  %s1728_s3 = inlined_call_operand.hbm [shape: f32[2,32,256], index: 3, kind: input, shape index: {}]   ;;  %s1729_s4 = inlined_call_operand.vmem [shape: f32[32,32], index: 4, kind: input, shape index: {}]   ;;  %s1730_s5 = inlined_call_operand.vmem [shape: f32[32,1], index: 5, kind: input, shape index: {}]   ;;  %s1731_s6 = inlined_call_operand.hbm [shape: f32[2,32,256], index: 6, kind: input, shape index: {}]   ;;  %s1732_s7 = inlined_call_operand.hbm [shape: f32[2,32,256], index: 7, kind: output, shape index: {}]  }
   0x1   :  { %1749 = sst [smem:[#allocation24_spill]] %s1725_s0 }
   0x2   :  { %1750 = sst [smem:[#allocation25_spill]] %s1727_s2 }
   0x3   :  { %12 = vsyncpa [#allocation5], 0 }
   0x4   :  { %13 = vsyncpa [#allocation3], 0 }
   0x5   :  { %15 = vsyncpa [#allocation3 + $0x1], 0 }
   0x6   :  { %16 = vsyncpa [#allocation8], 0 }
   0x7   :  { %18 = vsyncpa [#allocation8 + $0x1], 0 }
   0x8   :  { %19 = vsyncpa [#allocation11], 0 }
   0x9   :  { %21 = vsyncpa [#allocation11 + $0x1], 0 }
   0xa   :  { %22 = vsyncpa [#allocation4], 0 }
   0xb   :  { %24 = vsyncpa [#allocation4 + $0x1], 0  ;;  %s1308_s24 = smov 0   ;;  %s1310_s25 = smov 0  }
   0xc   :  { %s1312_s26 = smov 0   ;;  %s1314_s27 = smov 0  }
   0xd   :  { %s1316_s28 = smov 0   ;;  %s1318_s29 = smov 0  }
   0xe LB: > { %1751 = sst [smem:[#allocation18_spill]] %s1242_s26  ;;  %s42_s30 = sadd.s32 1, %s1250_s28  ;;  %s1254_s29 = sphi %s1318_s29, %s30_s29   ;;  %s1250_s28 = sphi %s1316_s28, %s1782_s28   ;;  %s1246_s27 = sphi %s1314_s27, %s1781_s27   ;;  %s1242_s26 = sphi %s1312_s26, %s1780_s26   ;;  %s1238_s25 = sphi %s1310_s25, %s1784_s25   ;;  %s1234_s24 = sphi %s1308_s24, %s1783_s24  }
   0xf   : > { %1752 = sst [smem:[#allocation19_spill]] %s1250_s28  ;;  %s72_s8 = sadd.s32 1, %s1242_s26 }
  0x10   : > { %1753 = sst [smem:[#allocation20_spill]] %s1254_s29  ;;  %p44_p0 = scmp.ge.s32.totalorder %s42_s30, 2 }
  0x11   : > { %p1733_p1 = scmp.ne.s32.totalorder %s1242_s26, %s1238_s25  ;;  %p80_p2 = scmp.eq.s32.totalorder %s1254_s29, 0 }
  0x12   : > { %s1786_s30 = smov (%p44_p0, %s42_s30), 0  ;;  %p965_p5 = scmp.lt.s32.totalorder %s1254_s29, 2 }
  0x13   : > { %1754 = sst [smem:[#allocation21_spill]] %s1786_s30  ;;  %p81_p4 = por %p80_p2, %p1733_p1 }
  0x14   : > { %s67_s9 = ssub.s32 %s1250_s28, %s1786_s30  ;;  %s1353_s10 = sand.u32 1, %s1242_s26  }
  0x15   : > { %p70_p6 = scmp.eq.s32.totalorder %s67_s9, 0  ;;  %s1356_s11 = sshll.u32 %s1353_s10, 6 }
  0x16   : > { %s1359_s12 = sshll.u32 %s1250_s28, 10  ;;  %p1361_p7 = pnand %p965_p5, %p81_p4 }
  0x17   : > { %s1366_s14 = scalar_select %p70_p6, %s1242_s26, %s72_s8  }
  0x18   : > { %s303_s15 = sand.u32 1, %s1254_s29   ;;  %s1757_s2 = sld [smem:[#allocation25_spill]] }
  0x19   : > { %1756 = sst [smem:[#allocation22_spill]] %s1366_s14  ;;  %s307_s19 = scalar_lea.vmem [#allocation7], %s1356_s11 }
  0x1a   : > { %s316_s20 = sshll.u32 %s307_s19, 4  ;;  %s1378_s21 = scalar_lea.sflag [#allocation8], %s303_s15  ;;  %s1376_s20 = int_to_ptr.vmem [resolvable:$true] %s316_s20 }
  0x1b   : > { %p1384_p9 = pneg %p1361_p7 }
  0x1e   : > { %s1373_s18 = scalar_lea.hbm %s1757_s2, %s1359_s12  ;;  %s1030_s16 = scalar_lea.hbm %s1757_s2, 2048 }
  0x1f   : > { %s1025_s22 = scalar_lea.hbm %s1373_s18, 1024  ;;  %p1031_p12 = scmp.lt.u32.totalorder %s1373_s18, %s1757_s2 }
  0x20   : > { %p1026_p8 = scmp.ne.s32.totalorder %s1373_s18, %s1025_s22  ;;  %p1032_p13 = scmp.lt.u32.totalorder %s1030_s16, %s1025_s22 }
  0x21   : > { %p1034_p2 = scmp.lt.u32.totalorder %s1025_s22, %s1373_s18 }
  0x22   : > { %p1028_p10 = pnand %p1384_p9, %p1026_p8  ;;  %p1033_p0 = por %p1032_p13, %p1031_p12 }
  0x24   : > { %p1029_p11 = pneg %p1028_p10  ;;  %p1035_p4 = por %p1034_p2, %p1033_p0 }
  0x26   : > { %p1036_p5 = pnand %p1035_p4, %p1029_p11 }
  0x28   : > { %1039 = shalt.err (!%p1036_p5)
}
  0x29   : > { %s1040_s15 = scalar_lea.vmem %s1376_s20, 1024  ;;  %s1256_s8 = smov [#allocation7]  }
  0x2a   : > { %p1041_p6 = scmp.ne.s32.totalorder %s1376_s20, %s1040_s15  ;;  %s1045_s9 = sshll.u32 %s1256_s8, 4  ;;  %s1046_s9 = int_to_ptr.vmem [resolvable:$false] %s1045_s9 }
  0x2b   : > { %s1047_s17 = scalar_lea.vmem %s1046_s9, 2048  ;;  %p1048_p3 = scmp.lt.s32.totalorder %s1376_s20, %s1046_s9 }
  0x2c   : > { %p1043_p8 = pnand %p1041_p6, %p1384_p9  ;;  %p1049_p1 = scmp.lt.s32.totalorder %s1047_s17, %s1040_s15 }
  0x2e   : > { %p1044_p10 = pneg %p1043_p8  ;;  %p1050_p12 = por %p1049_p1, %p1048_p3 }
  0x30   : > { %p1051_p13 = pnand %p1050_p12, %p1044_p10 }
  0x32   : > { %1054 = shalt.err (!%p1051_p13)
}
  0x33   : > { %s1734_s22 = smov 256   ;;  %s1736_s16 = smov 16  }
  0x34   : > { %953 = dma.hbm_to_vmem [thread:$0]  (!%p1361_p7), %s1373_s18, 1024, %s1376_s20, %s1378_s21, %s1734_s22, %s1734_s22, %s1736_s16  }
  0x35   : > { %s1412_s19 = sadd.s32 4294967295, %s1254_s29   ;;  %s878_s15 = sadd.s32 4294967294, %s1254_s29  }
  0x36   : > { %p85_p1 = scmp.ne.s32.totalorder %s1238_s25, %s1234_s24  ;;  %p1744_p3 = scmp.eq.s32.totalorder %s1412_s19, 0 }
  0x37   : > { %p237_p11 = scmp.eq.s32.totalorder %s1412_s19, 1  ;;  %p243_p0 = scmp.eq.s32.totalorder %s878_s15, 1 }
  0x38   : > { %p879_p2 = scmp.ge.s32.totalorder %s1254_s29, 1  ;;  %p1422_p4 = por %p1744_p3, %p85_p1 }
  0x39   : > { %p1760_p5 = scmp.ne.s32.totalorder %s1242_s26, %s1238_s25  ;;  %p1433_p8 = por %p243_p0, %p85_p1 }
  0x3a   : > { %s1759_s8 = scalar_select %p1422_p4, 1, 0 }
  0x3b   : > { %p1429_p6 = por %p237_p11, %p1760_p5  ;;  %p250_p10 = scmp.lt.s32.totalorder %s1254_s29, 3 }
  0x3c   : > { %s1762_s20 = scalar_select %p1433_p8, 1, 0 }
  0x3d   : > { %s1761_s18 = scalar_select %p1429_p6, 1, 0 }
  0x3e   : > { %1763 = sst [smem:[#allocation23_spill]] %s1762_s20  ;;  %s1764_s0 = sld [smem:[#allocation24_spill]] }
  0x3f   : > { %p1441_p12 = pnand %p879_p2, %p250_p10  ;;  %s1453_s30 = scalar_lea.hbm %s1726_s1, %s1359_s12 }
  0x40   : > { %s284_s9 = scalar_lea.vmem [#allocation6], %s1356_s11  ;;  %s281_s28 = scalar_lea.sflag [#allocation3], %s1353_s10 }
  0x41   : > { %s1765_s22 = scalar_select %p1441_p12, 1, 0 }
  0x42   : > { %p943_p13 = pneg %p1441_p12  ;;  %s293_s17 = sshll.u32 %s284_s9, 4  ;;  %s1462_s17 = int_to_ptr.vmem [resolvable:$true] %s293_s17 }
  0x43   : > { %s1055_s14 = scalar_lea.hbm %s1453_s30, 1024  ;;  %s1060_s26 = scalar_lea.hbm %s1726_s1, 2048 }
  0x44   : > { %s263_s15 = sshll.u32 %s1764_s0, 4  ;;  %p1458_p1 = pnand %p943_p13, %p1744_p3  ;;  %s1445_s15 = int_to_ptr.vmem [resolvable:$true] %s263_s15 }
  0x45   : > { %p1056_p11 = scmp.ne.s32.totalorder %s1453_s30, %s1055_s14  ;;  %p1061_p5 = scmp.lt.u32.totalorder %s1453_s30, %s1726_s1 }
  0x46   : > { %s1766_s0 = scalar_select %p1458_p1, 1, 0 }
  0x47   : > { %p1058_p0 = pnand %p1056_p11, %p1384_p9  ;;  %p1062_p10 = scmp.lt.u32.totalorder %s1060_s26, %s1055_s14 }
  0x48   : > { %p1064_p3 = scmp.lt.u32.totalorder %s1055_s14, %s1453_s30 }
  0x49   : > { %p1059_p2 = pneg %p1058_p0  ;;  %p1063_p13 = por %p1062_p10, %p1061_p5 }
  0x4b   : > { %p1065_p8 = por %p1064_p3, %p1063_p13 }
  0x4d   : > { %p1066_p6 = pnand %p1065_p8, %p1059_p2 }
  0x4f   : > { %1069 = shalt.err (!%p1066_p6)
}
  0x50   : > { %s1070_s9 = scalar_lea.vmem %s1462_s17, 1024  ;;  %s1259_s2 = smov [#allocation6]  }
  0x51   : > { %p1071_p11 = scmp.ne.s32.totalorder %s1462_s17, %s1070_s9  ;;  %s1075_s16 = sshll.u32 %s1259_s2, 4  ;;  %s1076_s16 = int_to_ptr.vmem [resolvable:$false] %s1075_s16 }
  0x52   : > { %s1077_s29 = scalar_lea.vmem %s1076_s16, 2048  ;;  %p1078_p12 = scmp.lt.s32.totalorder %s1462_s17, %s1076_s16 }
  0x53   : > { %p1073_p0 = pnand %p1071_p11, %p1384_p9  ;;  %p1079_p1 = scmp.lt.s32.totalorder %s1077_s29, %s1070_s9 }
  0x55   : > { %p1074_p4 = pneg %p1073_p0  ;;  %p1080_p5 = por %p1079_p1, %p1078_p12 }
  0x57   : > { %p1081_p10 = pnand %p1080_p5, %p1074_p4 }
  0x59   : > { %1084 = shalt.err (!%p1081_p10)
}
  0x5a   : > { %s1767_s26 = smov 16   ;;  %s1768_s14 = smov 256  }
  0x5b   : > { %950 = dma.hbm_to_vmem [thread:$0]  (!%p1361_p7), %s1453_s30, 1024, %s1462_s17, %s281_s28, %s1768_s14, %s1768_s14, %s1767_s26  }
  0x5c   : > { %s1085_s20 = scalar_lea.vmem %s1445_s15, 16  ;;  %p1769_p6 = scmp.ne.s32.totalorder %s1766_s0, 0 }
  0x5d   : > { %p1086_p3 = scmp.ne.s32.totalorder %s1445_s15, %s1085_s20  ;;  %p1093_p1 = scmp.lt.s32.totalorder %s1445_s15, %s1445_s15 }
  0x5e   : > { %p1087_p8 = pneg %p1769_p6  ;;  %p1094_p2 = scmp.lt.s32.totalorder %s1085_s20, %s1085_s20 }
  0x60   : > { %p1088_p4 = pnand %p1087_p8, %p1086_p3  ;;  %p1095_p13 = por %p1094_p2, %p1093_p1 }
  0x62   : > { %p1089_p12 = pneg %p1088_p4 }
  0x64   : > { %p1096_p11 = pnand %p1095_p13, %p1089_p12 }
  0x66   : > { %1099 = shalt.err (!%p1096_p11)
}
  0x67   : > { %s1260_s9 = smov [#allocation2]   ;;  %s1504_s17 = scalar_lea.hbm %s1728_s3, %s1359_s12 }
  0x68   : > { %946 = dma.vmem_to_smem (!%p1769_p6), %s1445_s15, 16, %s1260_s9, [#allocation5]  }
  0x69   : > { %s330_s2 = scalar_lea.vmem [#allocation9], %s1356_s11  ;;  %s1100_s29 = scalar_lea.hbm %s1504_s17, 1024 }
  0x6a   : > { %s339_s16 = sshll.u32 %s330_s2, 4  ;;  %p1101_p0 = scmp.ne.s32.totalorder %s1504_s17, %s1100_s29  ;;  %s1507_s16 = int_to_ptr.vmem [resolvable:$true] %s339_s16 }
  0x6b   : > { %s1105_s20 = scalar_lea.hbm %s1728_s3, 2048  ;;  %p1106_p3 = scmp.lt.u32.totalorder %s1504_s17, %s1728_s3 }
  0x6c   : > { %p1103_p5 = pnand %p1101_p0, %p1384_p9  ;;  %p1107_p6 = scmp.lt.u32.totalorder %s1105_s20, %s1100_s29 }
  0x6d   : > { %p1109_p4 = scmp.lt.u32.totalorder %s1100_s29, %s1504_s17 }
  0x6e   : > { %p1104_p10 = pneg %p1103_p5  ;;  %p1108_p8 = por %p1107_p6, %p1106_p3 }
  0x70   : > { %p1110_p12 = por %p1109_p4, %p1108_p8 }
  0x72   : > { %p1111_p1 = pnand %p1110_p12, %p1104_p10 }
  0x74   : > { %1114 = shalt.err (!%p1111_p1)
}
  0x75   : > { %s1115_s30 = scalar_lea.vmem %s1507_s16, 1024  ;;  %s1261_s2 = smov [#allocation9]  }
  0x76   : > { %p1116_p2 = scmp.ne.s32.totalorder %s1507_s16, %s1115_s30  ;;  %s1120_s0 = sshll.u32 %s1261_s2, 4  ;;  %s1121_s0 = int_to_ptr.vmem [resolvable:$false] %s1120_s0 }
  0x77   : > { %s1122_s15 = scalar_lea.vmem %s1121_s0, 2048  ;;  %p1123_p0 = scmp.lt.s32.totalorder %s1507_s16, %s1121_s0 }
  0x78   : > { %p1118_p13 = pnand %p1116_p2, %p1384_p9  ;;  %p1124_p5 = scmp.lt.s32.totalorder %s1122_s15, %s1115_s30 }
  0x7a   : > { %p1119_p11 = pneg %p1118_p13  ;;  %p1125_p3 = por %p1124_p5, %p1123_p0 }
  0x7c   : > { %p1126_p6 = pnand %p1125_p3, %p1119_p11 }
  0x7e   : > { %1129 = shalt.err (!%p1126_p6)
}
  0x7f   : > { %956 = dma.hbm_to_vmem [thread:$0]  (!%p1361_p7), %s1504_s17, 1024, %s1507_s16, %s1378_s21, %s1768_s14, %s1768_s14, %s1767_s26  }
  0x80   : > { %s1538_s9 = scalar_lea.hbm %s1731_s6, %s1359_s12  ;;  %s353_s28 = scalar_lea.vmem [#allocation10], %s1356_s11 }
  0x81   : > { %s362_s30 = sshll.u32 %s353_s28, 4  ;;  %s350_s2 = scalar_lea.sflag [#allocation11], %s1353_s10  ;;  %s1541_s30 = int_to_ptr.vmem [resolvable:$true] %s362_s30 }
  0x82   : > { %s1130_s0 = scalar_lea.hbm %s1538_s9, 1024  ;;  %s1135_s16 = scalar_lea.hbm %s1731_s6, 2048 }
  0x83   : > { %p1131_p10 = scmp.ne.s32.totalorder %s1538_s9, %s1130_s0  ;;  %p1136_p12 = scmp.lt.u32.totalorder %s1538_s9, %s1731_s6 }
  0x84   : > { %p1137_p1 = scmp.lt.u32.totalorder %s1135_s16, %s1130_s0  ;;  %p1139_p13 = scmp.lt.u32.totalorder %s1130_s0, %s1538_s9 }
  0x85   : > { %p1133_p8 = pnand %p1131_p10, %p1384_p9 }
  0x86   : > { %p1138_p2 = por %p1137_p1, %p1136_p12 }
  0x87   : > { %p1134_p4 = pneg %p1133_p8 }
  0x88   : > { %p1140_p11 = por %p1139_p13, %p1138_p2 }
  0x8a   : > { %p1141_p0 = pnand %p1140_p11, %p1134_p4 }
  0x8c   : > { %1144 = shalt.err (!%p1141_p0)
}
  0x8d   : > { %s1145_s11 = scalar_lea.vmem %s1541_s30, 1024  ;;  %s1262_s29 = smov [#allocation10]  }
  0x8e   : > { %p1146_p5 = scmp.ne.s32.totalorder %s1541_s30, %s1145_s11  ;;  %s1150_s20 = sshll.u32 %s1262_s29, 4  ;;  %s1151_s20 = int_to_ptr.vmem [resolvable:$false] %s1150_s20 }
  0x8f   : > { %s1152_s28 = scalar_lea.vmem %s1151_s20, 2048  ;;  %p1153_p10 = scmp.lt.s32.totalorder %s1541_s30, %s1151_s20 }
  0x90   : > { %p1148_p3 = pnand %p1146_p5, %p1384_p9  ;;  %p1154_p8 = scmp.lt.s32.totalorder %s1152_s28, %s1145_s11 }
  0x92   : > { %p1149_p6 = pneg %p1148_p3  ;;  %p1155_p12 = por %p1154_p8, %p1153_p10 }
  0x94   : > { %p1156_p1 = pnand %p1155_p12, %p1149_p6 }
  0x96   : > { %1159 = shalt.err (!%p1156_p1)
}
  0x97   : > { %959 = dma.hbm_to_vmem [thread:$0]  (!%p1361_p7), %s1538_s9, 1024, %s1541_s30, %s350_s2, %s1768_s14, %s1768_s14, %s1767_s26  }
  0x98   : > { %p1770_p9 = scmp.ne.s32.totalorder %s1765_s22, 0 }
  0x99   : > { %p1771_p4 = scmp.eq.s32.totalorder (!%p1770_p9), %s1412_s19, 0 }
  0x9a   : > { %374 = sbr.rel (%p1770_p9) target bundleno = 436 (0x1b4), region = 48 }
  0xa1   : > { %1213 = dma.done.wait (%p1771_p4), [#allocation5], 16   ;;  %p1772_p2 = pmov %p1771_p4 }
  0xa2   : > { %s1577_s13 = sand.u32 1, %s1238_s25   ;;  %p1773_p7 = scmp.ne.s32.totalorder %s1759_s8, 0 }
  0xa3   : > { %1215 = vsyncadd (%p1772_p2), [#allocation5], 4294967280  ;;  %s1580_s23 = sshll.u32 %s1577_s13, 6  ;;  %s381_s10 = scalar_lea.sflag [#allocation3], %s1577_s13 }
  0xa4   : > { %s1584_s26 = scalar_lea.vmem [#allocation6], %s1580_s23 }
  0xa5   : > { %1217 = dma.done.wait (%p1773_p7), %s381_s10, 1024  }
  0xa6   : > { %1219 = vsyncadd (%p1773_p7), %s381_s10, 4294966272  ;;  %s389_s22 = sand.u32 1, %s1412_s19   ;;  %s1592_s9 = scalar_lea.vmem [#allocation7], %s1580_s23 }
  0xa7   : > { %s390_s14 = scalar_lea.sflag [#allocation8], %s389_s22 }
  0xa8   : > { %1221 = dma.done.wait (%p1773_p7), %s390_s14, 2048  }
  0xa9   : > { %1223 = vsyncadd (%p1773_p7), %s390_s14, 4294965248  ;;  %s1599_s30 = scalar_lea.vmem [#allocation9], %s1580_s23  ;;  %s408_s2 = scalar_lea.sflag [#allocation11], %s1577_s13 }
  0xaa   : > { %s1603_s0 = scalar_lea.vmem [#allocation10], %s1580_s23 }
  0xab   : > { %1225 = dma.done.wait (%p1773_p7), %s408_s2, 1024  }
  0xac   : > { %1227 = vsyncadd (%p1773_p7), %s408_s2, 4294966272 }
  0xad   : > { %416 = sfence }
  0xae   : > { %s463_s19 = sld [smem:[#allocation2]]  ;;  %s901_s21 = sld [smem:[#allocation2 + $0x1]]  ;;  %v1263_v0 = vmov 0.0   ;;  %v465_v1 = vld [vmem:[%s1584_s26 + $0x8] sm:$0xff]  ;;  %v1264_v2 = vmov 0   ;;  %v467_v3 = vld [vmem:[%s1584_s26 + $0x18] sm:$0xff] }
  0xaf   : > { %s902_s17 = sld [smem:[#allocation2 + $0x2]]  ;;  %638 = vmatprep.mubr.f32.mxu0 %v1263_v0  ;;  %650 = vmatprep.mubr.f32.mxu1 %v1263_v0  ;;  %v483_v4 = vld [vmem:[%s1592_s9 + $0x8] sm:$0xff]  ;;  %v485_v5 = vld [vmem:[%s1592_s9 + $0x18] sm:$0xff]  ;;  %v464_v6 = vld [vmem:[%s1584_s26] sm:$0xff]  ;;  %vm561_vm0 = vcmask 261120   ;;  %p1774_p11 = scmp.ne.s32.totalorder %s1761_s18, 0 }
  0xb0   : > { %1024 = vset.pattern.permute.xlu1 %v1264_v2  ;;  %1023 = vset.pattern.permute.xlu0 %v1264_v2  ;;  %v466_v7 = vld [vmem:[%s1584_s26 + $0x10] sm:$0xff]  ;;  %v482_v8 = vld [vmem:[%s1592_s9] sm:$0xff]  ;;  %v509_v11 = vld [vmem:[%s1599_s30 + $0x8] sm:$0xff]  ;;  %s1265_s15 = smov [#allocation12]  }
  0xb1   : > { %v511_v12 = vld [vmem:[%s1599_s30 + $0x18] sm:$0xff]  ;;  %v484_v17 = vld [vmem:[%s1592_s9 + $0x10] sm:$0xff]  ;;  %v508_v18 = vld [vmem:[%s1599_s30] sm:$0xff]  ;;  %s1164_s11 = sshll.u32 %s1265_s15, 4  ;;  %s1165_s11 = int_to_ptr.vmem [resolvable:$false] %s1164_s11 }
  0xb2   : > { %v510_v19 = vld [vmem:[%s1599_s30 + $0x10] sm:$0xff]  ;;  %v469_v24 = vld [vmem:[%s1584_s26 + $0x28] sm:$0xff]  ;;  %v471_v25 = vld [vmem:[%s1584_s26 + $0x38] sm:$0xff]  ;;  %s1166_s29 = scalar_lea.vmem %s1165_s11, 2048 }
  0xb3   : > { %v487_v26 = vld [vmem:[%s1592_s9 + $0x28] sm:$0xff]  ;;  %v489_v31 = vld [vmem:[%s1592_s9 + $0x38] sm:$0xff]  ;;  %v468_v38 = vld [vmem:[%s1584_s26 + $0x20] sm:$0xff] }
  0xb4   : > { %v472_v9 = vstv %s463_s19  ;;  %v490_v10 = vstv %s901_s21  ;;  %v513_v32 = vld [vmem:[%s1599_s30 + $0x28] sm:$0xff]  ;;  %v515_v33 = vld [vmem:[%s1599_s30 + $0x38] sm:$0xff]  ;;  %s916_s21 = sshll.u32 %s1246_s27, 10 }
  0xb5   : > { %v474_v13 = vmul.f32 %v472_v9, %v465_v1  ;;  %v476_v14 = vmul.f32 %v472_v9, %v467_v3  ;;  %v492_v15 = vmul.f32 %v490_v10, %v483_v4  ;;  %v494_v16 = vmul.f32 %v490_v10, %v485_v5  ;;  %v539_v39 = vld [vmem:[%s1730_s5 + $0x10] sm:$0xff]  ;;  %v537_v40 = vld [vmem:[%s1730_s5] sm:$0xff]  ;;  %v540_v58 = vld [vmem:[%s1730_s5 + $0x18] sm:$0xff] }
  0xb6   : > { %v516_v20 = vstv %s902_s17  ;;  %v473_v21 = vmul.f32 %v472_v9, %v464_v6  ;;  %v475_v22 = vmul.f32 %v472_v9, %v466_v7  ;;  %v491_v23 = vmul.f32 %v490_v10, %v482_v8  ;;  %v470_v45 = vld [vmem:[%s1584_s26 + $0x30] sm:$0xff]  ;;  %553 = vperm.xlu1 %1024, %v539_v39   ;;  %v486_v50 = vld [vmem:[%s1592_s9 + $0x20] sm:$0xff]  ;;  %543 = vperm.xlu0 %1023, %v537_v40   ;;  %v538_v63 = vld [vmem:[%s1730_s5 + $0x8] sm:$0xff]  ;;  %s457_s17 = scalar_lea.vmem [#allocation12], %s1580_s23  ;;  %s1674_s23 = scalar_lea.hbm %s1732_s7, %s916_s21 }
  0xb7   : > { %v500_v27 = vadd.f32 %v492_v15, %v474_v13  ;;  %v502_v28 = vadd.f32 %v494_v16, %v476_v14  ;;  %v518_v29 = vmul.f32 %v516_v20, %v509_v11  ;;  %v520_v30 = vmul.f32 %v516_v20, %v511_v12  ;;  %v488_v51 = vld [vmem:[%s1592_s9 + $0x30] sm:$0xff]  ;;  %v512_v52 = vld [vmem:[%s1599_s30 + $0x20] sm:$0xff]  ;;  %v534_v16 = vld [vmem:[%s1729_s4 + $0x8] sm:$0xff]  ;;  %s703_s8 = sshll.u32 %s457_s17, 4  ;;  %s1676_s8 = int_to_ptr.vmem [resolvable:$true] %s703_s8 }
  0xb8   : > { %v493_v34 = vmul.f32 %v490_v10, %v484_v17  ;;  %v499_v35 = vadd.f32 %v491_v23, %v473_v21  ;;  %v517_v36 = vmul.f32 %v516_v20, %v508_v18  ;;  %v519_v37 = vmul.f32 %v516_v20, %v510_v19  ;;  %v514_v57 = vld [vmem:[%s1599_s30 + $0x30] sm:$0xff]  ;;  %v536_v17 = vld [vmem:[%s1729_s4 + $0x18] sm:$0xff]  ;;  %v663_v21 = vld [vmem:[%s1603_s0] sm:$0xff]  ;;  %s1160_s12 = scalar_lea.vmem %s1676_s8, 1024  ;;  %p1167_p3 = scmp.lt.s32.totalorder %s1676_s8, %s1165_s11 }
  0xb9   : > { %v526_v41 = vadd.f32 %v518_v29, %v500_v27  ;;  %v528_v42 = vadd.f32 %v520_v30, %v502_v28  ;;  %v478_v43 = vmul.f32 %v472_v9, %v469_v24  ;;  %v480_v44 = vmul.f32 %v472_v9, %v471_v25  ;;  %v535_v15 = vld [vmem:[%s1729_s4 + $0x10] sm:$0xff]  ;;  %v667_v23 = vld [vmem:[%s1603_s0 + $0x20] sm:$0xff]  ;;  %v668_v28 = vld [vmem:[%s1603_s0 + $0x28] sm:$0xff]  ;;  %p1161_p13 = scmp.ne.s32.totalorder %s1676_s8, %s1160_s12  ;;  %p1168_p6 = scmp.lt.s32.totalorder %s1166_s29, %s1160_s12 }
  0xba   : > { %v501_v46 = vadd.f32 %v493_v34, %v475_v22  ;;  %v525_v47 = vadd.f32 %v517_v36, %v499_v35  ;;  %v496_v48 = vmul.f32 %v490_v10, %v487_v26  ;;  %v498_v49 = vmul.f32 %v490_v10, %v489_v31  ;;  %558 = vperm.xlu1 %1024, %v540_v58   ;;  %v664_v26 = vld [vmem:[%s1603_s0 + $0x8] sm:$0xff]  ;;  %v669_v40 = vld [vmem:[%s1603_s0 + $0x30] sm:$0xff] }
  0xbb   : > { %v917_v53 = vpack.c.bf16 %v528_v42, %v526_v41  ;;  %v522_v54 = vmul.f32 %v516_v20, %v513_v32  ;;  %v524_v55 = vmul.f32 %v516_v20, %v515_v33  ;;  %v477_v56 = vmul.f32 %v472_v9, %v468_v38  ;;  %548 = vperm.xlu0 %1023, %v538_v63   ;;  %v665_v38 = vld [vmem:[%s1603_s0 + $0x10] sm:$0xff]  ;;  %p1162_p0 = pnand %p1161_p13, %p1774_p11  ;;  %p1169_p10 = por %p1168_p6, %p1167_p3 }
  0xbc   : > { %v527_v59 = vadd.f32 %v519_v37, %v501_v46  ;;  %v504_v60 = vadd.f32 %v496_v48, %v478_v43  ;;  %v506_v61 = vadd.f32 %v498_v49, %v480_v44  ;;  %v479_v62 = vmul.f32 %v472_v9, %v470_v45  ;;  %v666_v44 = vld [vmem:[%s1603_s0 + $0x18] sm:$0xff] }
  0xbd   : > { %918 = vmatprep.subr.bf16.mxu0 %v917_v53  ;;  %925 = vmatprep.subr.bf16.mxu1 %v917_v53  ;;  %v495_v1 = vmul.f32 %v490_v10, %v486_v50  ;;  %v497_v2 = vmul.f32 %v490_v10, %v488_v51  ;;  %v521_v3 = vmul.f32 %v516_v20, %v512_v52  ;;  %v533_v10 = vld [vmem:[%s1729_s4] sm:$0xff]  ;;  %v670_v46 = vld [vmem:[%s1603_s0 + $0x38] sm:$0xff]  ;;  %s688_s0 = scalar_lea.sflag [#allocation4], %s1577_s13  ;;  %p1163_p5 = pneg %p1162_p0 }
  0xbe   : > { %v919_v4 = vpack.c.bf16 %v527_v59, %v525_v47  ;;  %v530_v5 = vadd.f32 %v522_v54, %v504_v60  ;;  %v532_v6 = vadd.f32 %v524_v55, %v506_v61  ;;  %v523_v7 = vmul.f32 %v516_v20, %v514_v57 }
  0xbf   : > { %v503_v8 = vadd.f32 %v495_v1, %v477_v56  ;;  %v505_v11 = vadd.f32 %v497_v2, %v479_v62  ;;  %p1170_p8 = pnand %p1169_p10, %p1163_p5 }
  0xc0   : > { %920 = vmatpush1.bf16.msra.mxu0 %v919_v4  ;;  %927 = vmatpush1.bf16.msra.mxu1 %v919_v4  ;;  %v921_v9 = vpack.c.bf16 %v532_v6, %v530_v5 }
  0xc1   : > { %v529_v12 = vadd.f32 %v521_v3, %v503_v8  ;;  %v531_v13 = vadd.f32 %v523_v7, %v505_v11 }
  0xc2   : > { %922 = vmatprep.subr.bf16.mxu0 %v921_v9  ;;  %926 = vmatprep.subr.bf16.mxu1 %v921_v9 }
  0xc3   : > { %v923_v14 = vpack.c.bf16 %v531_v13, %v529_v12 }
  0xc5   : > { %924 = vmatpush1.bf16.msra.mxu0 %v923_v14  ;;  %928 = vmatpush1.bf16.msra.mxu1 %v923_v14 }
  0xc8   : > { %903 = vmatmul.mubr.msk.f32.vlgmr.msra.gmra.mrb[0].mxu0 %vm561_vm0, %v533_v10  ;;  %905 = vmatmul.mubr.msk.f32.vlgmr.msra.gmra.mrb[0].mxu1 %vm561_vm0, %v535_v15 }
  0xc9   : > { %644 = vmatprep.mubr.f32.mxu0 %v1263_v0  ;;  %656 = vmatprep.mubr.f32.mxu1 %v1263_v0 }
  0xcc   : > { %904 = vmatmul.mubr.msk.f32.gmra.mrb[2].mxu0 %vm561_vm0, %v534_v16  ;;  %906 = vmatmul.mubr.msk.f32.gmra.mrb[2].mxu1 %vm561_vm0, %v536_v17 }
 0x135   : > { %v554_v18 = vpop.permute.xlu1 %553  ;;  %v544_v19 = vpop.permute.xlu0 %543 }
 0x139   : > { %v559_v33 = vpop.permute.xlu1 %558 }
 0x13a   : > { %v549_v34 = vpop.permute.xlu0 %548 }
 0x19b   : > { %v640_v20 = vpop.f32.mrb[0].mxu0  ;;  %v652_v22 = vpop.f32.mrb[0].mxu1 }
 0x19c   : > { %v641_v24 = vadd.f32 %v640_v20, %v544_v19  ;;  %v653_v0 = vadd.f32 %v652_v22, %v554_v18  ;;  %v642_v25 = vpop.f32.mrb[1].mxu0  ;;  %v654_v27 = vpop.f32.mrb[1].mxu1 }
 0x19d   : > { %v643_v29 = vadd.f32 %v642_v25, %v544_v19  ;;  %v655_v30 = vadd.f32 %v654_v27, %v554_v18 }
 0x19e   : > { %v671_v31 = vadd.f32 %v663_v21, %v641_v24  ;;  %v675_v32 = vadd.f32 %v667_v23, %v653_v0 }
 0x19f   : > { %v672_v35 = vadd.f32 %v664_v26, %v643_v29  ;;  %v676_v36 = vadd.f32 %v668_v28, %v655_v30  ;;  %v646_v37 = vpop.f32.mrb[2].mxu0  ;;  %v658_v39 = vpop.f32.mrb[2].mxu1 }
 0x1a0   : > { %679 = vst [vmem:[%s457_s17] sm:$0xff] %v671_v31  ;;  %683 = vst [vmem:[%s457_s17 + $0x20] sm:$0xff] %v675_v32  ;;  %v647_v41 = vadd.f32 %v646_v37, %v549_v34  ;;  %v659_v42 = vadd.f32 %v658_v39, %v559_v33  ;;  %v648_v43 = vpop.f32.mrb[3].mxu0  ;;  %v660_v45 = vpop.f32.mrb[3].mxu1 }
 0x1a1   : > { %680 = vst [vmem:[%s457_s17 + $0x8] sm:$0xff] %v672_v35  ;;  %684 = vst [vmem:[%s457_s17 + $0x28] sm:$0xff] %v676_v36  ;;  %v649_v47 = vadd.f32 %v648_v43, %v549_v34  ;;  %v661_v48 = vadd.f32 %v660_v45, %v559_v33 }
 0x1a2   : > { %v673_v49 = vadd.f32 %v665_v38, %v647_v41  ;;  %v677_v50 = vadd.f32 %v669_v40, %v659_v42 }
 0x1a3   : > { %v674_v51 = vadd.f32 %v666_v44, %v649_v47  ;;  %v678_v52 = vadd.f32 %v670_v46, %v661_v48 }
 0x1a4   : > { %681 = vst [vmem:[%s457_s17 + $0x10] sm:$0xff] %v673_v49  ;;  %685 = vst [vmem:[%s457_s17 + $0x30] sm:$0xff] %v677_v50 }
 0x1a5   : > { %682 = vst [vmem:[%s457_s17 + $0x18] sm:$0xff] %v674_v51  ;;  %686 = vst [vmem:[%s457_s17 + $0x38] sm:$0xff] %v678_v52 }
 0x1a6   : > { %1173 = shalt.err (!%p1170_p8)
}
 0x1a7   : > { %s1174_s20 = scalar_lea.hbm %s1674_s23, 1024  ;;  %s1178_s26 = scalar_lea.hbm %s1732_s7, 2048 }
 0x1a8   : > { %p1175_p12 = scmp.ne.s32.totalorder %s1674_s23, %s1174_s20  ;;  %p1179_p4 = scmp.lt.u32.totalorder %s1674_s23, %s1732_s7 }
 0x1a9   : > { %p1180_p2 = scmp.lt.u32.totalorder %s1178_s26, %s1174_s20  ;;  %p1182_p13 = scmp.lt.u32.totalorder %s1174_s20, %s1674_s23 }
 0x1aa   : > { %p1176_p1 = pnand %p1175_p12, %p1774_p11 }
 0x1ab   : > { %p1181_p7 = por %p1180_p2, %p1179_p4 }
 0x1ac   : > { %p1177_p9 = pneg %p1176_p1 }
 0x1ad   : > { %p1183_p0 = por %p1182_p13, %p1181_p7 }
 0x1af   : > { %p1184_p5 = pnand %p1183_p0, %p1177_p9 }
 0x1b1   : > { %1187 = shalt.err (!%p1184_p5)
}
 0x1b2   : > { %s1266_s9 = smov 256   ;;  %s1267_s30 = smov 16  }
 0x1b3   : > { %941 = dma.vmem_to_hbm [thread:$0]  (%p1774_p11), %s1676_s8, 1024, %s1674_s23, %s688_s0, %s1266_s9, %s1266_s9, %s1267_s30  }
 0x1b4 PF: > { %s1775_s2 = sld [smem:[#allocation23_spill]]  ;;  %s1776_s19 = sld [smem:[#allocation20_spill]] }
 0x1b5   : > { %s718_s21 = sand.u32 1, %s1234_s24  }
 0x1b6   : > { %s719_s17 = scalar_lea.sflag [#allocation4], %s718_s21 }
 0x1ba   : > { %p1777_p3 = scmp.ne.s32.totalorder %s1775_s2, 0  ;;  %p1778_p6 = scmp.ge.s32.totalorder %s1776_s19, 2 }
 0x1bc   : > { %p961_p10 = pnand %p1778_p6, %p1777_p3 }
 0x1be   : > { %1229 = dma.done.wait (!%p961_p10), %s719_s17, 1024  }
 0x1bf   : > { %1231 = vsyncadd (!%p961_p10), %s719_s17, 4294966272  ;;  %s30_s29 = sadd.s32 1, %s1776_s19   ;;  %s1779_s16 = sld [smem:[#allocation18_spill]] }
 0x1c0   : > { %p27_p8 = scmp.ge.s32.totalorder %s30_s29, 4   ;;  %s1780_s26 = sld [smem:[#allocation22_spill]] }
 0x1c1   : > { %s1781_s27 = sld [smem:[#allocation19_spill]]  ;;  %s1782_s28 = sld [smem:[#allocation21_spill]] }
 0x1c2   : > { %s1783_s24 = smov %s1238_s25  ;;  %29 = sbr.rel (!%p27_p8) target bundleno = 14 (0xe), region = 135 }
 0x1c5   : > { %s1784_s25 = smov %s1779_s16 }
 0x1c9   :  { %724 = vsyncpa [#allocation3], 1 }
 0x1ca   :  { %726 = vsyncpa [#allocation3 + $0x1], 1 }
 0x1cb   :  { %727 = vsyncpa [#allocation8], 1 }
 0x1cc   :  { %729 = vsyncpa [#allocation8 + $0x1], 1 }
 0x1cd   :  { %730 = vsyncpa [#allocation11], 1 }
 0x1ce   :  { %732 = vsyncpa [#allocation11 + $0x1], 1 }
 0x1cf   :  { %733 = vsyncpa [#allocation4], 1 }
 0x1d0   :  { %735 = vsyncpa [#allocation4 + $0x1], 1 }
 0x1d1   :  { %736 = vsyncpa [#allocation5], 1 }
 0x1d2   :  { %738 = vsyncpa [#allocation5 + $0x1], 1 }

</bundles_post_ra>
